<compile_context>
chip_gen: v5e
topology: v5e:2x2
jax: 0.10.0
libtpu: 0.0.40
codegen_flags: <defaults>
</compile_context>

<pallas_src>
import functools

import jax
import jax.numpy as jnp
from jax.experimental import pallas as pl
from jax.experimental.pallas import tpu as pltpu

HIDDEN = 128


def _round_up(x, m):
    return ((x + m - 1) // m) * m


def actor_critic_kernel(x_ref, w1_ref, b1_ref, w2_ref, b2_ref,
                        wh_ref, bh_ref, out_ref, *, output_dim):
    x = x_ref[...]

    # fc layer 1 + ReLU
    h1 = jnp.dot(x, w1_ref[...], preferred_element_type=jnp.float32) + b1_ref[...]
    h1 = jnp.maximum(h1, 0.0)

    # fc layer 2 + ReLU
    h2 = jnp.dot(h1, w2_ref[...], preferred_element_type=jnp.float32) + b2_ref[...]
    h2 = jnp.maximum(h2, 0.0)

    # Fused actor+critic head: a single MXU pass producing a lane-dense
    # (TILE_B, HEAD_PAD) slab.  Columns [0:output_dim] are actor logits,
    # column output_dim is the critic value, remaining columns are zero
    # (zero weights + zero bias padding).
    head = jnp.dot(h2, wh_ref[...], preferred_element_type=jnp.float32) + bh_ref[...]

    col = jax.lax.broadcasted_iota(jnp.int32, head.shape, dimension=1)
    is_actor = col < output_dim
    is_value = col == output_dim

    # Numerically-stable softmax restricted to the real actor columns:
    # masked columns get -inf logits -> exp(-inf) = 0, so they contribute
    # nothing to the denominator.
    logits = jnp.where(is_actor, head, -jnp.inf)
    m = jnp.max(logits, axis=-1, keepdims=True)
    e = jnp.exp(logits - m)
    denom = jnp.sum(e, axis=-1, keepdims=True)
    probs = e * pl.reciprocal(denom, approx=False)

    # Lane-dense output slab: probs | value | zeros.
    out_ref[...] = jnp.where(is_value, head, probs).astype(out_ref.dtype)


def actor_critic_forward(x, params, *, tile_b=128):
    """x: (batch, input_dim) float32. params: dict of transposed weights/biases.

    Returns (probs (batch, output_dim), value (batch, 1))."""
    batch, input_dim = x.shape
    wa, ba = params["wa"], params["ba"]
    wc, bc = params["wc"], params["bc"]
    output_dim = wa.shape[1]

    # Fuse actor + critic weights into one lane-dense (128, HEAD_PAD) block.
    head_pad = max(128, _round_up(output_dim + 1, 128))
    w_head = jnp.zeros((HIDDEN, head_pad), jnp.float32)
    w_head = w_head.at[:, :output_dim].set(wa)
    w_head = w_head.at[:, output_dim:output_dim + 1].set(wc)
    b_head = jnp.zeros((1, head_pad), jnp.float32)
    b_head = b_head.at[:, :output_dim].set(ba)
    b_head = b_head.at[:, output_dim:output_dim + 1].set(bc)

    # Pad batch so every grid step runs a full TILE_B x K matmul (full MXU rows).
    batch_pad = max(tile_b, _round_up(batch, tile_b))
    if batch_pad != batch:
        x = jnp.pad(x, ((0, batch_pad - batch), (0, 0)))

    grid = (batch_pad // tile_b,)

    flops = 2 * batch_pad * (input_dim * HIDDEN + HIDDEN * HIDDEN + HIDDEN * head_pad)
    bytes_accessed = 4 * (
        batch_pad * input_dim                 # x
        + input_dim * HIDDEN + HIDDEN         # w1, b1
        + HIDDEN * HIDDEN + HIDDEN            # w2, b2
        + HIDDEN * head_pad + head_pad        # fused head
        + batch_pad * head_pad                # output slab
    )

    slab = pl.pallas_call(
        functools.partial(actor_critic_kernel, output_dim=output_dim),
        out_shape=jax.ShapeDtypeStruct((batch_pad, head_pad), jnp.float32),
        grid=grid,
        in_specs=[
            # Activations: tiled along the (parallel) batch grid axis.
            pl.BlockSpec((tile_b, input_dim), lambda b: (b, 0)),
            # Weights/biases: constant index maps -> resident across grid steps.
            pl.BlockSpec((input_dim, HIDDEN), lambda b: (0, 0)),
            pl.BlockSpec((1, HIDDEN), lambda b: (0, 0)),
            pl.BlockSpec((HIDDEN, HIDDEN), lambda b: (0, 0)),
            pl.BlockSpec((1, HIDDEN), lambda b: (0, 0)),
            pl.BlockSpec((HIDDEN, head_pad), lambda b: (0, 0)),
            pl.BlockSpec((1, head_pad), lambda b: (0, 0)),
        ],
        out_specs=pl.BlockSpec((tile_b, head_pad), lambda b: (b, 0)),
        compiler_params=pltpu.CompilerParams(
            dimension_semantics=("parallel",)),
        cost_estimate=pl.CostEstimate(
            flops=flops,
            transcendentals=batch_pad * output_dim,
            bytes_accessed=bytes_accessed),
    )(x, params["w1"], params["b1"], params["w2"], params["b2"], w_head, b_head)

    probs = slab[:batch, :output_dim]
    value = slab[:batch, output_dim:output_dim + 1]
    return probs, value


def init_params(key, input_dim, output_dim, hidden=HIDDEN):
    """Deterministic PyTorch-Linear-style init (uniform(-1/sqrt(fan_in), +1/sqrt(fan_in))).
    Weights stored transposed: (in_features, out_features)."""
    ks = jax.random.split(key, 8)

    def linear(kw, kb, fan_in, fan_out):
        bound = 1.0 / jnp.sqrt(fan_in)
        w = jax.random.uniform(kw, (fan_in, fan_out), jnp.float32, -bound, bound)
        b = jax.random.uniform(kb, (1, fan_out), jnp.float32, -bound, bound)
        return w, b

    w1, b1 = linear(ks[0], ks[1], input_dim, hidden)
    w2, b2 = linear(ks[2], ks[3], hidden, hidden)
    wa, ba = linear(ks[4], ks[5], hidden, output_dim)
    wc, bc = linear(ks[6], ks[7], hidden, 1)
    return dict(w1=w1, b1=b1, w2=w2, b2=b2, wa=wa, ba=ba, wc=wc, bc=bc)


def reference_forward(x, p):
    """Pure-JAX reference mirroring the PyTorch forward."""
    h = jnp.maximum(x @ p["w1"] + p["b1"], 0.0)
    h = jnp.maximum(h @ p["w2"] + p["b2"], 0.0)
    logits = h @ p["wa"] + p["ba"]
    probs = jax.nn.softmax(logits, axis=-1)
    value = h @ p["wc"] + p["bc"]
    return probs, value


if __name__ == "__main__":
    batch, input_dim, output_dim = 8, 32, 8

    key = jax.random.PRNGKey(0)
    k_x, k_params = jax.random.split(key)

    x = jax.random.normal(k_x, (batch, input_dim), jnp.float32)
    params = init_params(k_params, input_dim, output_dim)

    probs, value = actor_critic_forward(x, params)
    jax.block_until_ready((probs, value))

    # sanity check against pure-JAX reference
    probs_ref, value_ref = reference_forward(x, params)
    assert probs.shape == (batch, output_dim)
    assert value.shape == (batch, 1)
    assert jnp.allclose(probs, probs_ref, atol=1e-5, rtol=1e-5)
    assert jnp.allclose(value, value_ref, atol=1e-5, rtol=1e-5)
    assert jnp.allclose(jnp.sum(probs, axis=-1), 1.0, atol=1e-5)

    print("KERNEL_OK")
</pallas_src>

<mosaic_0001>
module attributes {stable_mosaic.version = 11 : i64} {
  func.func @actor_critic_kernel(%arg0: i32, %arg1: memref<128x32xf32, #tpu.memory_space<vmem>>, %arg2: memref<32x128xf32, #tpu.memory_space<vmem>>, %arg3: memref<1x128xf32, #tpu.memory_space<vmem>>, %arg4: memref<128x128xf32, #tpu.memory_space<vmem>>, %arg5: memref<1x128xf32, #tpu.memory_space<vmem>>, %arg6: memref<128x128xf32, #tpu.memory_space<vmem>>, %arg7: memref<1x128xf32, #tpu.memory_space<vmem>>, %arg8: memref<128x128xf32, #tpu.memory_space<vmem>>) attributes {dimension_semantics = [#tpu.dimension_semantics<parallel>], iteration_bounds = array<i64: 1>, scalar_prefetch = 0 : i64, scratch_operands = 0 : i64, tpu.core_type = #tpu.core_type<tc>, window_params = [{transform_indices = @transform_0, window_bounds = array<i64: 128, 32>}, {pipeline_mode = #tpu.pipeline_mode<synchronous>, transform_indices = @transform_1, window_bounds = array<i64: 32, 128>}, {pipeline_mode = #tpu.pipeline_mode<synchronous>, transform_indices = @transform_2, window_bounds = array<i64: 1, 128>}, {pipeline_mode = #tpu.pipeline_mode<synchronous>, transform_indices = @transform_3, window_bounds = array<i64: 128, 128>}, {pipeline_mode = #tpu.pipeline_mode<synchronous>, transform_indices = @transform_4, window_bounds = array<i64: 1, 128>}, {pipeline_mode = #tpu.pipeline_mode<synchronous>, transform_indices = @transform_5, window_bounds = array<i64: 128, 128>}, {pipeline_mode = #tpu.pipeline_mode<synchronous>, transform_indices = @transform_6, window_bounds = array<i64: 1, 128>}, {transform_indices = @transform_7, window_bounds = array<i64: 128, 128>}]} {
    %c0 = arith.constant 0 : index
    %c0_0 = arith.constant 0 : index
    %0 = vector.load %arg1[%c0, %c0_0] : memref<128x32xf32, #tpu.memory_space<vmem>>, vector<128x32xf32>
    %c0_1 = arith.constant 0 : index
    %c0_2 = arith.constant 0 : index
    %1 = vector.load %arg2[%c0_1, %c0_2] : memref<32x128xf32, #tpu.memory_space<vmem>>, vector<32x128xf32>
    %cst = arith.constant dense<0.000000e+00> : vector<128x128xf32>
    %2 = tpu.matmul %0, %1, %cst {dimension_numbers = #tpu.dot_dimension_numbers<[1], [0], [0], [1], [0, 0, 1, 1], [], []>} : vector<128x32xf32>, vector<32x128xf32>, vector<128x128xf32> -> vector<128x128xf32>
    %c0_3 = arith.constant 0 : index
    %c0_4 = arith.constant 0 : index
    %3 = vector.load %arg3[%c0_3, %c0_4] : memref<1x128xf32, #tpu.memory_space<vmem>>, vector<1x128xf32>
    %4 = vector.broadcast %3 : vector<1x128xf32> to vector<128x128xf32>
    %5 = arith.addf %2, %4 : vector<128x128xf32>
    %cst_5 = arith.constant 0.000000e+00 : f32
    %6 = vector.broadcast %cst_5 : f32 to vector<128x128xf32>
    %7 = arith.maximumf %5, %6 : vector<128x128xf32>
    %c0_6 = arith.constant 0 : index
    %c0_7 = arith.constant 0 : index
    %8 = vector.load %arg4[%c0_6, %c0_7] : memref<128x128xf32, #tpu.memory_space<vmem>>, vector<128x128xf32>
    %cst_8 = arith.constant dense<0.000000e+00> : vector<128x128xf32>
    %9 = tpu.matmul %7, %8, %cst_8 {dimension_numbers = #tpu.dot_dimension_numbers<[1], [0], [0], [1], [0, 0, 1, 1], [], []>} : vector<128x128xf32>, vector<128x128xf32>, vector<128x128xf32> -> vector<128x128xf32>
    %c0_9 = arith.constant 0 : index
    %c0_10 = arith.constant 0 : index
    %10 = vector.load %arg5[%c0_9, %c0_10] : memref<1x128xf32, #tpu.memory_space<vmem>>, vector<1x128xf32>
    %11 = vector.broadcast %10 : vector<1x128xf32> to vector<128x128xf32>
    %12 = arith.addf %9, %11 : vector<128x128xf32>
    %cst_11 = arith.constant 0.000000e+00 : f32
    %13 = vector.broadcast %cst_11 : f32 to vector<128x128xf32>
    %14 = arith.maximumf %12, %13 : vector<128x128xf32>
    %c0_12 = arith.constant 0 : index
    %c0_13 = arith.constant 0 : index
    %15 = vector.load %arg6[%c0_12, %c0_13] : memref<128x128xf32, #tpu.memory_space<vmem>>, vector<128x128xf32>
    %cst_14 = arith.constant dense<0.000000e+00> : vector<128x128xf32>
    %16 = tpu.matmul %14, %15, %cst_14 {dimension_numbers = #tpu.dot_dimension_numbers<[1], [0], [0], [1], [0, 0, 1, 1], [], []>} : vector<128x128xf32>, vector<128x128xf32>, vector<128x128xf32> -> vector<128x128xf32>
    %c0_15 = arith.constant 0 : index
    %c0_16 = arith.constant 0 : index
    %17 = vector.load %arg7[%c0_15, %c0_16] : memref<1x128xf32, #tpu.memory_space<vmem>>, vector<1x128xf32>
    %18 = vector.broadcast %17 : vector<1x128xf32> to vector<128x128xf32>
    %19 = arith.addf %16, %18 : vector<128x128xf32>
    %20 = tpu.iota {dimensions = array<i32: 1>} : vector<128x128xi32>
    %c8_i32 = arith.constant 8 : i32
    %21 = vector.broadcast %c8_i32 : i32 to vector<128x128xi32>
    %22 = arith.cmpi slt, %20, %21 : vector<128x128xi32>
    %c8_i32_17 = arith.constant 8 : i32
    %23 = vector.broadcast %c8_i32_17 : i32 to vector<128x128xi32>
    %24 = arith.cmpi eq, %20, %23 : vector<128x128xi32>
    %cst_18 = arith.constant 0xFF800000 : f32
    %25 = vector.broadcast %cst_18 : f32 to vector<128x128xf32>
    %26 = arith.select %22, %19, %25 : vector<128x128xi1>, vector<128x128xf32>
    %cst_19 = arith.constant dense<0xFF800000> : vector<128xf32>
    %27 = vector.multi_reduction <maximumf>, %26, %cst_19 [1] : vector<128x128xf32> to vector<128xf32>
    %28 = vector.shape_cast %27 : vector<128xf32> to vector<128x1xf32>
    %29 = vector.broadcast %28 : vector<128x1xf32> to vector<128x128xf32>
    %30 = arith.subf %26, %29 : vector<128x128xf32>
    %31 = math.exp %30 : vector<128x128xf32>
    %cst_20 = arith.constant dense<0.000000e+00> : vector<128xf32>
    %32 = vector.multi_reduction <add>, %31, %cst_20 [1] : vector<128x128xf32> to vector<128xf32>
    %33 = vector.shape_cast %32 : vector<128xf32> to vector<128x1xf32>
    %34 = tpu.reciprocal %33 : vector<128x1xf32> -> vector<128x1xf32>
    %35 = vector.broadcast %34 : vector<128x1xf32> to vector<128x128xf32>
    %36 = arith.mulf %31, %35 : vector<128x128xf32>
    %37 = arith.select %24, %19, %36 : vector<128x128xi1>, vector<128x128xf32>
    %c0_21 = arith.constant 0 : index
    %c0_22 = arith.constant 0 : index
    %38 = vector.load %arg8[%c0_21, %c0_22] : memref<128x128xf32, #tpu.memory_space<vmem>>, vector<128x128xf32>
    tpu.vector_store %arg8[%c0_21, %c0_22], %37 {strides = array<i32>} : memref<128x128xf32, #tpu.memory_space<vmem>>, vector<128x128xf32>,
    return
  }
  func.func @transform_0(%arg0: i32) -> (i32, i32) {
    %c0_i32 = arith.constant 0 : i32
    %c0_i32_0 = arith.constant 0 : i32
    return %arg0, %c0_i32 : i32, i32
  }
  func.func @transform_1(%arg0: i32) -> (i32, i32) {
    %c0_i32 = arith.constant 0 : i32
    %c0_i32_0 = arith.constant 0 : i32
    %c0_i32_1 = arith.constant 0 : i32
    return %c0_i32, %c0_i32_0 : i32, i32
  }
  func.func @transform_2(%arg0: i32) -> (i32, i32) {
    %c0_i32 = arith.constant 0 : i32
    %c0_i32_0 = arith.constant 0 : i32
    %c0_i32_1 = arith.constant 0 : i32
    return %c0_i32, %c0_i32_0 : i32, i32
  }
  func.func @transform_3(%arg0: i32) -> (i32, i32) {
    %c0_i32 = arith.constant 0 : i32
    %c0_i32_0 = arith.constant 0 : i32
    %c0_i32_1 = arith.constant 0 : i32
    return %c0_i32, %c0_i32_0 : i32, i32
  }
  func.func @transform_4(%arg0: i32) -> (i32, i32) {
    %c0_i32 = arith.constant 0 : i32
    %c0_i32_0 = arith.constant 0 : i32
    %c0_i32_1 = arith.constant 0 : i32
    return %c0_i32, %c0_i32_0 : i32, i32
  }
  func.func @transform_5(%arg0: i32) -> (i32, i32) {
    %c0_i32 = arith.constant 0 : i32
    %c0_i32_0 = arith.constant 0 : i32
    %c0_i32_1 = arith.constant 0 : i32
    return %c0_i32, %c0_i32_0 : i32, i32
  }
  func.func @transform_6(%arg0: i32) -> (i32, i32) {
    %c0_i32 = arith.constant 0 : i32
    %c0_i32_0 = arith.constant 0 : i32
    %c0_i32_1 = arith.constant 0 : i32
    return %c0_i32, %c0_i32_0 : i32, i32
  }
  func.func @transform_7(%arg0: i32) -> (i32, i32) {
    %c0_i32 = arith.constant 0 : i32
    %c0_i32_0 = arith.constant 0 : i32
    return %arg0, %c0_i32 : i32, i32
  }
}

</mosaic_0001>

<bundles_post_ra>
// kernel: tpu_custom_call.1
= control target key start
LH: loop header
LB: loop body
LE: loop exit
PB: predicated region body
PF: predicated region fallthrough
CT: control target
= control target key end

     0   :  { %12 = vsyncpa [#allocation3], 0  ;;  %s1458_s0 = inlined_call_operand.vmem [shape: f32[128,32], index: 0, kind: input, shape index: {}]   ;;  %s1459_s1 = inlined_call_operand.vmem [shape: f32[32,128], index: 1, kind: input, shape index: {}]   ;;  %s1460_s2 = inlined_call_operand.vmem [shape: f32[1,128], index: 2, kind: input, shape index: {}]   ;;  %s1461_s3 = inlined_call_operand.vmem [shape: f32[128,128], index: 3, kind: input, shape index: {}]   ;;  %s1462_s4 = inlined_call_operand.vmem [shape: f32[1,128], index: 4, kind: input, shape index: {}]   ;;  %s1463_s5 = inlined_call_operand.hbm [shape: f32[128,128], index: 5, kind: input, shape index: {}]   ;;  %s1464_s6 = inlined_call_operand.vmem [shape: f32[1,128], index: 6, kind: input, shape index: {}]   ;;  %s1465_s7 = inlined_call_operand.hbm [shape: f32[128,128], index: 7, kind: output, shape index: {}]  }
   0x1   :  { %13 = vsyncpa [#allocation4], 0  ;;  %s28_s26 = sshll.u32 %s1463_s5, 4  ;;  %s977_s27 = smov [#allocation2]   ;;  %s29_s26 = int_to_ptr.hbm [resolvable:$true] %s28_s26 }
   0x2   :  { %s30_s28 = sshll.u32 %s977_s27, 4  ;;  %s978_s29 = smov 128   ;;  %s31_s28 = int_to_ptr.vmem [resolvable:$true] %s30_s28 }
   0x3   :  { %s979_s30 = smov 8  }
   0x4   :  { %36 = dma.hbm_to_vmem [thread:$0]  %s29_s26, 2048, %s31_s28, [#allocation3], %s978_s29, %s978_s29, %s979_s30  }
   0x5   :  { %973 = dma.done.wait [#allocation3], 2048  }
   0x6   :  { %974 = vsyncadd [#allocation3], 4294965248  ;;  %v62_v0 = vld [vmem:[%s1459_s1 + $0x18] sm:$0xff]  ;;  %v61_v1 = vld [vmem:[%s1459_s1 + $0x10] sm:$0xff]  ;;  %vm67_vm0 = vcmask 261120   ;;  %s793_s15 = sshll.u32 %s1465_s7, 4  ;;  %s794_s15 = int_to_ptr.hbm [resolvable:$true] %s793_s15 }
   0x7   :  { %128 = vmatpush.msra.mxu0 %v62_v0  ;;  %v60_v2 = vld [vmem:[%s1459_s1 + $0x8] sm:$0xff]  ;;  %v59_v3 = vld [vmem:[%s1459_s1] sm:$0xff]  ;;  %v45_v6 = vld [vmem:[%s1458_s0 + $0x10] sm:$0xff] }
   0x8   :  { %v43_v4 = vld [vmem:[%s1458_s0] sm:$0xff]  ;;  %v44_v5 = vld [vmem:[%s1458_s0 + $0x8] sm:$0xff]  ;;  %v46_v7 = vld [vmem:[%s1458_s0 + $0x18] sm:$0xff] }
   0x9   :  { %129 = vmatpush.msra.mxu0 %v61_v1  ;;  %v47_v8 = vld [vmem:[%s1458_s0 + $0x20] sm:$0xff]  ;;  %v48_v9 = vld [vmem:[%s1458_s0 + $0x28] sm:$0xff]  ;;  %v49_v10 = vld [vmem:[%s1458_s0 + $0x30] sm:$0xff] }
   0xa   :  { %v50_v11 = vld [vmem:[%s1458_s0 + $0x38] sm:$0xff]  ;;  %v51_v12 = vld [vmem:[%s1458_s0 + $0x40] sm:$0xff]  ;;  %v211_v14 = vld [vmem:[%s1461_s3 + $0x70] sm:$0xff] }
   0xb   :  { %130 = vmatpush.msra.mxu0 %v60_v2  ;;  %v212_v13 = vld [vmem:[%s1461_s3 + $0x78] sm:$0xff]  ;;  %v210_v15 = vld [vmem:[%s1461_s3 + $0x68] sm:$0xff]  ;;  %v209_v17 = vld [vmem:[%s1461_s3 + $0x60] sm:$0xff] }
   0xc   :  { %217 = vmatpush.msra.mxu1 %v212_v13  ;;  %822 = vmatpush.msra.mxu3 %v212_v13  ;;  %v52_v16 = vld [vmem:[%s1458_s0 + $0x48] sm:$0xff]  ;;  %v208_v18 = vld [vmem:[%s1461_s3 + $0x58] sm:$0xff]  ;;  %v207_v19 = vld [vmem:[%s1461_s3 + $0x50] sm:$0xff] }
   0xd   :  { %131 = vmatpush.msra.mxu0 %v59_v3  ;;  %v206_v20 = vld [vmem:[%s1461_s3 + $0x48] sm:$0xff]  ;;  %v53_v21 = vld [vmem:[%s1458_s0 + $0x50] sm:$0xff]  ;;  %v205_v22 = vld [vmem:[%s1461_s3 + $0x40] sm:$0xff] }
   0xe   :  { %806 = vmatmul.msk.f32.vlgmr.msra.gmra.mxu0 %vm67_vm0, %v43_v4  ;;  %218 = vmatpush.msra.mxu1 %v211_v14  ;;  %v204_v23 = vld [vmem:[%s1461_s3 + $0x38] sm:$0xff]  ;;  %v203_v24 = vld [vmem:[%s1461_s3 + $0x30] sm:$0xff]  ;;  %v202_v25 = vld [vmem:[%s1461_s3 + $0x28] sm:$0xff] }
   0xf   :  { %823 = vmatpush.msra.mxu3 %v211_v14  ;;  %v54_v26 = vld [vmem:[%s1458_s0 + $0x58] sm:$0xff]  ;;  %v201_v27 = vld [vmem:[%s1461_s3 + $0x20] sm:$0xff]  ;;  %v199_v29 = vld [vmem:[%s1461_s3 + $0x10] sm:$0xff] }
  0x10   :  { %219 = vmatpush.msra.mxu1 %v210_v15  ;;  %v200_v28 = vld [vmem:[%s1461_s3 + $0x18] sm:$0xff]  ;;  %v55_v30 = vld [vmem:[%s1458_s0 + $0x60] sm:$0xff]  ;;  %v198_v31 = vld [vmem:[%s1461_s3 + $0x8] sm:$0xff] }
  0x11   :  { %824 = vmatpush.msra.mxu3 %v210_v15  ;;  %v197_v32 = vld [vmem:[%s1461_s3] sm:$0xff]  ;;  %v56_v33 = vld [vmem:[%s1458_s0 + $0x68] sm:$0xff]  ;;  %v57_v34 = vld [vmem:[%s1458_s0 + $0x70] sm:$0xff] }
  0x12   :  { %220 = vmatpush.msra.mxu1 %v209_v17  ;;  %v58_v35 = vld [vmem:[%s1458_s0 + $0x78] sm:$0xff]  ;;  %v1154_v36 = vld [vmem:[%s1460_s2] ss:$0 sm:$0xff]  ;;  %v312_v3 = vld [vmem:[#allocation2 + $0x70] sm:$0xff] }
  0x13   :  { %825 = vmatpush.msra.mxu3 %v209_v17  ;;  %v313_v0 = vld [vmem:[#allocation2 + $0x78] sm:$0xff]  ;;  %v306_v13 = vld [vmem:[#allocation2 + $0x40] sm:$0xff]  ;;  %v304_v17 = vld [vmem:[#allocation2 + $0x30] sm:$0xff] }
  0x14   :  { %221 = vmatpush.msra.mxu1 %v208_v18  ;;  %318 = vmatpush.msra.mxu2 %v313_v0  ;;  %v305_v14 = vld [vmem:[#allocation2 + $0x38] sm:$0xff] }
  0x15   :  { %826 = vmatpush.msra.mxu3 %v208_v18 }
  0x16   :  { %807 = vmatmul.msk.f32.gmra.mxu0 %vm67_vm0, %v44_v5  ;;  %222 = vmatpush.msra.mxu1 %v207_v19  ;;  %v311_v5 = vld [vmem:[#allocation2 + $0x68] sm:$0xff] }
  0x17   :  { %827 = vmatpush.msra.mxu3 %v207_v19  ;;  %319 = vmatpush.msra.mxu2 %v312_v3  ;;  %v303_v19 = vld [vmem:[#allocation2 + $0x28] sm:$0xff] }
  0x18   :  { %223 = vmatpush.msra.mxu1 %v206_v20 }
  0x19   :  { %828 = vmatpush.msra.mxu3 %v206_v20  ;;  %320 = vmatpush.msra.mxu2 %v311_v5  ;;  %v302_v20 = vld [vmem:[#allocation2 + $0x20] sm:$0xff] }
  0x1a   :  { %224 = vmatpush.msra.mxu1 %v205_v22 }
  0x1b   :  { %829 = vmatpush.msra.mxu3 %v205_v22 }
  0x1c   :  { %225 = vmatpush.msra.mxu1 %v204_v23 }
  0x1d   :  { %830 = vmatpush.msra.mxu3 %v204_v23 }
  0x1e   :  { %808 = vmatmul.msk.f32.gmra.mxu0 %vm67_vm0, %v45_v6  ;;  %226 = vmatpush.msra.mxu1 %v203_v24  ;;  %v310_v6 = vld [vmem:[#allocation2 + $0x60] sm:$0xff] }
  0x1f   :  { %831 = vmatpush.msra.mxu3 %v203_v24  ;;  %321 = vmatpush.msra.mxu2 %v310_v6  ;;  %v300_v24 = vld [vmem:[#allocation2 + $0x10] sm:$0xff] }
  0x20   :  { %227 = vmatpush.msra.mxu1 %v202_v25 }
  0x21   :  { %832 = vmatpush.msra.mxu3 %v202_v25 }
  0x22   :  { %228 = vmatpush.msra.mxu1 %v201_v27 }
  0x23   :  { %833 = vmatpush.msra.mxu3 %v201_v27  ;;  %v298_v27 = vld [vmem:[#allocation2] sm:$0xff] }
  0x24   :  { %229 = vmatpush.msra.mxu1 %v200_v28 }
  0x25   :  { %834 = vmatpush.msra.mxu3 %v200_v28 }
  0x26   :  { %809 = vmatmul.msk.f32.gmra.mxu0 %vm67_vm0, %v46_v7  ;;  %230 = vmatpush.msra.mxu1 %v199_v29  ;;  %v309_v7 = vld [vmem:[#allocation2 + $0x58] sm:$0xff] }
  0x27   :  { %835 = vmatpush.msra.mxu3 %v199_v29  ;;  %322 = vmatpush.msra.mxu2 %v309_v7 }
  0x28   :  { %231 = vmatpush.msra.mxu1 %v198_v31 }
  0x29   :  { %836 = vmatpush.msra.mxu3 %v198_v31 }
  0x2a   :  { %232 = vmatpush.msra.mxu1 %v197_v32 }
  0x2b   :  { %837 = vmatpush.msra.mxu3 %v197_v32 }
  0x2d   :  { %838 = vmatpush.msrb.mxu3 %v313_v0 }
  0x2e   :  { %810 = vmatmul.msk.f32.gmra.mxu0 %vm67_vm0, %v47_v8 }
  0x2f   :  { %839 = vmatpush.msrb.mxu3 %v312_v3 }
  0x31   :  { %840 = vmatpush.msrb.mxu3 %v311_v5 }
  0x33   :  { %841 = vmatpush.msrb.mxu3 %v310_v6 }
  0x35   :  { %842 = vmatpush.msrb.mxu3 %v309_v7 }
  0x36   :  { %811 = vmatmul.msk.f32.gmra.mxu0 %vm67_vm0, %v48_v9 }
  0x3e   :  { %812 = vmatmul.msk.f32.gmra.mxu0 %vm67_vm0, %v49_v10  ;;  %v308_v10 = vld [vmem:[#allocation2 + $0x50] sm:$0xff] }
  0x3f   :  { %323 = vmatpush.msra.mxu2 %v308_v10  ;;  %843 = vmatpush.msrb.mxu3 %v308_v10 }
  0x46   :  { %813 = vmatmul.msk.f32.gmra.mxu0 %vm67_vm0, %v50_v11 }
  0x4e   :  { %814 = vmatmul.msk.f32.gmra.mxu0 %vm67_vm0, %v51_v12  ;;  %v307_v12 = vld [vmem:[#allocation2 + $0x48] sm:$0xff] }
  0x4f   :  { %324 = vmatpush.msra.mxu2 %v307_v12  ;;  %844 = vmatpush.msrb.mxu3 %v307_v12 }
  0x51   :  { %325 = vmatpush.msra.mxu2 %v306_v13  ;;  %845 = vmatpush.msrb.mxu3 %v306_v13 }
  0x53   :  { %326 = vmatpush.msra.mxu2 %v305_v14  ;;  %846 = vmatpush.msrb.mxu3 %v305_v14 }
  0x55   :  { %327 = vmatpush.msra.mxu2 %v304_v17  ;;  %847 = vmatpush.msrb.mxu3 %v304_v17 }
  0x56   :  { %815 = vmatmul.msk.f32.gmra.mxu0 %vm67_vm0, %v52_v16 }
  0x57   :  { %328 = vmatpush.msra.mxu2 %v303_v19  ;;  %848 = vmatpush.msrb.mxu3 %v303_v19 }
  0x59   :  { %329 = vmatpush.msra.mxu2 %v302_v20  ;;  %849 = vmatpush.msrb.mxu3 %v302_v20 }
  0x5e   :  { %816 = vmatmul.msk.f32.gmra.mxu0 %vm67_vm0, %v53_v21  ;;  %v301_v21 = vld [vmem:[#allocation2 + $0x18] sm:$0xff] }
  0x5f   :  { %330 = vmatpush.msra.mxu2 %v301_v21  ;;  %850 = vmatpush.msrb.mxu3 %v301_v21  ;;  %v383_v21 = vlaneseq }
  0x61   :  { %331 = vmatpush.msra.mxu2 %v300_v24  ;;  %851 = vmatpush.msrb.mxu3 %v300_v24  ;;  %v1180_v24 = vld [vmem:[%s1464_s6] ss:$0 sm:$0xff]  ;;  %s980_s6 = smov [#allocation5]  }
  0x62   :  { %s791_s12 = sshll.u32 %s980_s6, 4  ;;  %s792_s12 = int_to_ptr.vmem [resolvable:$true] %s791_s12 }
  0x66   :  { %817 = vmatmul.msk.f32.gmra.mxu0 %vm67_vm0, %v54_v26  ;;  %v299_v26 = vld [vmem:[#allocation2 + $0x8] sm:$0xff] }
  0x67   :  { %332 = vmatpush.msra.mxu2 %v299_v26  ;;  %852 = vmatpush.msrb.mxu3 %v299_v26 }
  0x69   :  { %333 = vmatpush.msra.mxu2 %v298_v27  ;;  %853 = vmatpush.msrb.mxu3 %v298_v27 }
  0x6e   :  { %818 = vmatmul.msk.f32.gmra.mxu0 %vm67_vm0, %v55_v30 }
  0x76   :  { %819 = vmatmul.msk.f32.gmra.mxu0 %vm67_vm0, %v56_v33 }
  0x7e   :  { %820 = vmatmul.msk.f32.gmra.mxu0 %vm67_vm0, %v57_v34 }
  0x86   :  { %821 = vmatmul.msk.f32.gmra.mxu0 %vm67_vm0, %v58_v35 }
  0x8b   :  { %v133_v37 = vpop.f32.mrf.mxu0 }
  0x8c   :  { %v134_v38 = vadd.f32 %v1154_v36, %v133_v37 }
  0x8e   :  { %v181_v39 = vmax.f32 %v134_v38, 0.0  ;;  %v859_v38 = vld [vmem:[%s1462_s4] ss:$0 sm:$0xff] }
  0x90   :  { %233 = vmatmul.f32.vlgmr.msra.gmra.mxu1 %v181_v39 }
  0x93   :  { %v136_v40 = vpop.f32.mrf.mxu0 }
  0x94   :  { %v137_v41 = vadd.f32 %v1154_v36, %v136_v40 }
  0x96   :  { %v182_v42 = vmax.f32 %v137_v41, 0.0 }
  0x98   :  { %236 = vmatmul.f32.gmra.mxu1 %v182_v42 }
  0x9b   :  { %v139_v43 = vpop.f32.mrf.mxu0 }
  0x9c   :  { %v140_v44 = vadd.f32 %v1154_v36, %v139_v43 }
  0x9e   :  { %v183_v45 = vmax.f32 %v140_v44, 0.0 }
  0xa0   :  { %239 = vmatmul.f32.gmra.mxu1 %v183_v45 }
  0xa3   :  { %v142_v46 = vpop.f32.mrf.mxu0 }
  0xa4   :  { %v143_v47 = vadd.f32 %v1154_v36, %v142_v46 }
  0xa6   :  { %v184_v48 = vmax.f32 %v143_v47, 0.0 }
  0xa8   :  { %242 = vmatmul.f32.gmra.mxu1 %v184_v48 }
  0xab   :  { %v145_v49 = vpop.f32.mrf.mxu0 }
  0xac   :  { %v146_v50 = vadd.f32 %v1154_v36, %v145_v49 }
  0xae   :  { %v185_v51 = vmax.f32 %v146_v50, 0.0 }
  0xb0   :  { %245 = vmatmul.f32.gmra.mxu1 %v185_v51 }
  0xb3   :  { %v148_v52 = vpop.f32.mrf.mxu0 }
  0xb4   :  { %v149_v53 = vadd.f32 %v1154_v36, %v148_v52 }
  0xb6   :  { %v186_v54 = vmax.f32 %v149_v53, 0.0 }
  0xb8   :  { %248 = vmatmul.f32.gmra.mxu1 %v186_v54 }
  0xbb   :  { %v151_v55 = vpop.f32.mrf.mxu0 }
  0xbc   :  { %v152_v56 = vadd.f32 %v1154_v36, %v151_v55 }
  0xbe   :  { %v187_v57 = vmax.f32 %v152_v56, 0.0 }
  0xc0   :  { %251 = vmatmul.f32.gmra.mxu1 %v187_v57 }
  0xc3   :  { %v154_v58 = vpop.f32.mrf.mxu0 }
  0xc4   :  { %v155_v59 = vadd.f32 %v1154_v36, %v154_v58 }
  0xc6   :  { %v188_v60 = vmax.f32 %v155_v59, 0.0 }
  0xc8   :  { %254 = vmatmul.f32.gmra.mxu1 %v188_v60 }
  0xcb   :  { %v157_v61 = vpop.f32.mrf.mxu0 }
  0xcc   :  { %v158_v62 = vadd.f32 %v1154_v36, %v157_v61 }
  0xce   :  { %v189_v63 = vmax.f32 %v158_v62, 0.0 }
  0xd0   :  { %257 = vmatmul.f32.gmra.mxu1 %v189_v63 }
  0xd3   :  { %v160_v1 = vpop.f32.mrf.mxu0 }
  0xd4   :  { %v161_v2 = vadd.f32 %v1154_v36, %v160_v1 }
  0xd6   :  { %v190_v4 = vmax.f32 %v161_v2, 0.0 }
  0xd8   :  { %260 = vmatmul.f32.gmra.mxu1 %v190_v4 }
  0xdb   :  { %v163_v8 = vpop.f32.mrf.mxu0 }
  0xdc   :  { %v164_v9 = vadd.f32 %v1154_v36, %v163_v8 }
  0xde   :  { %v191_v11 = vmax.f32 %v164_v9, 0.0 }
  0xe0   :  { %263 = vmatmul.f32.gmra.mxu1 %v191_v11 }
  0xe3   :  { %v166_v15 = vpop.f32.mrf.mxu0 }
  0xe4   :  { %v167_v16 = vadd.f32 %v1154_v36, %v166_v15 }
  0xe6   :  { %v192_v18 = vmax.f32 %v167_v16, 0.0 }
  0xe8   :  { %266 = vmatmul.f32.gmra.mxu1 %v192_v18 }
  0xeb   :  { %v169_v22 = vpop.f32.mrf.mxu0 }
  0xec   :  { %v170_v23 = vadd.f32 %v1154_v36, %v169_v22 }
  0xee   :  { %v193_v25 = vmax.f32 %v170_v23, 0.0  ;;  %v1175_v23 = vand.u32 127, %v383_v21 }
  0xf0   :  { %269 = vmatmul.f32.vlgmr.msra.gmra.mxu3 %v193_v25  ;;  %vm385_vm1 = vcmp.lt.s32.totalorder %v1175_v23, 8  ;;  %vm386_vm6 = vcmp.eq.s32.totalorder %v1175_v23, 8 }
  0xf3   :  { %v172_v28 = vpop.f32.mrf.mxu0 }
  0xf4   :  { %v173_v29 = vadd.f32 %v1154_v36, %v172_v28 }
  0xf6   :  { %v194_v30 = vmax.f32 %v173_v29, 0.0 }
  0xf8   :  { %272 = vmatmul.f32.gmra.mxu3 %v194_v30 }
  0xfb   :  { %v175_v31 = vpop.f32.mrf.mxu0 }
  0xfc   :  { %v176_v32 = vadd.f32 %v1154_v36, %v175_v31 }
  0xfe   :  { %v195_v33 = vmax.f32 %v176_v32, 0.0 }
 0x100   :  { %275 = vmatmul.f32.gmra.mxu3 %v195_v33 }
 0x103   :  { %v178_v34 = vpop.f32.mrf.mxu0 }
 0x104   :  { %v179_v35 = vadd.f32 %v1154_v36, %v178_v34 }
 0x106   :  { %v196_v37 = vmax.f32 %v179_v35, 0.0 }
 0x108   :  { %278 = vmatmul.f32.gmra.mxu3 %v196_v37 }
 0x10d   :  { %v234_v39 = vpop.f32.mrf.mxu1 }
 0x10e   :  { %v235_v40 = vadd.f32 %v859_v38, %v234_v39 }
 0x110   :  { %v282_v41 = vmax.f32 %v235_v40, 0.0 }
 0x112   :  { %334 = vmatmul.f32.vlgmr.msra.gmra.mxu2 %v282_v41 }
 0x115   :  { %v237_v42 = vpop.f32.mrf.mxu1 }
 0x116   :  { %v238_v43 = vadd.f32 %v859_v38, %v237_v42 }
 0x118   :  { %v283_v44 = vmax.f32 %v238_v43, 0.0 }
 0x11a   :  { %337 = vmatmul.f32.gmra.mxu2 %v283_v44 }
 0x11d   :  { %v240_v45 = vpop.f32.mrf.mxu1 }
 0x11e   :  { %v241_v46 = vadd.f32 %v859_v38, %v240_v45 }
 0x120   :  { %v284_v47 = vmax.f32 %v241_v46, 0.0 }
 0x122   :  { %340 = vmatmul.f32.gmra.mxu2 %v284_v47 }
 0x125   :  { %v243_v48 = vpop.f32.mrf.mxu1 }
 0x126   :  { %v244_v36 = vadd.f32 %v859_v38, %v243_v48 }
 0x128   :  { %v285_v49 = vmax.f32 %v244_v36, 0.0 }
 0x12a   :  { %343 = vmatmul.f32.gmra.mxu2 %v285_v49 }
 0x12d   :  { %v246_v50 = vpop.f32.mrf.mxu1 }
 0x12e   :  { %v247_v51 = vadd.f32 %v859_v38, %v246_v50 }
 0x130   :  { %v286_v52 = vmax.f32 %v247_v51, 0.0 }
 0x132   :  { %346 = vmatmul.f32.gmra.mxu2 %v286_v52 }
 0x135   :  { %v249_v53 = vpop.f32.mrf.mxu1 }
 0x136   :  { %v250_v54 = vadd.f32 %v859_v38, %v249_v53 }
 0x138   :  { %v287_v55 = vmax.f32 %v250_v54, 0.0 }
 0x13a   :  { %349 = vmatmul.f32.gmra.mxu2 %v287_v55 }
 0x13d   :  { %v252_v56 = vpop.f32.mrf.mxu1 }
 0x13e   :  { %v253_v57 = vadd.f32 %v859_v38, %v252_v56 }
 0x140   :  { %v288_v58 = vmax.f32 %v253_v57, 0.0 }
 0x142   :  { %352 = vmatmul.f32.gmra.mxu2 %v288_v58 }
 0x145   :  { %v255_v59 = vpop.f32.mrf.mxu1 }
 0x146   :  { %v256_v60 = vadd.f32 %v859_v38, %v255_v59 }
 0x148   :  { %v289_v61 = vmax.f32 %v256_v60, 0.0 }
 0x14a   :  { %355 = vmatmul.f32.gmra.mxu2 %v289_v61 }
 0x14d   :  { %v258_v62 = vpop.f32.mrf.mxu1 }
 0x14e   :  { %v259_v63 = vadd.f32 %v859_v38, %v258_v62 }
 0x150   :  { %v290_v0 = vmax.f32 %v259_v63, 0.0 }
 0x152   :  { %358 = vmatmul.f32.gmra.mxu2 %v290_v0 }
 0x155   :  { %v261_v1 = vpop.f32.mrf.mxu1 }
 0x156   :  { %v262_v2 = vadd.f32 %v859_v38, %v261_v1 }
 0x158   :  { %v291_v3 = vmax.f32 %v262_v2, 0.0 }
 0x15a   :  { %361 = vmatmul.f32.gmra.mxu2 %v291_v3 }
 0x15d   :  { %v264_v4 = vpop.f32.mrf.mxu1 }
 0x15e   :  { %v265_v5 = vadd.f32 %v859_v38, %v264_v4 }
 0x160   :  { %v292_v6 = vmax.f32 %v265_v5, 0.0 }
 0x162   :  { %364 = vmatmul.f32.gmra.mxu2 %v292_v6 }
 0x165   :  { %v267_v7 = vpop.f32.mrf.mxu1 }
 0x166   :  { %v268_v8 = vadd.f32 %v859_v38, %v267_v7 }
 0x168   :  { %v293_v9 = vmax.f32 %v268_v8, 0.0 }
 0x16a   :  { %367 = vmatmul.f32.gmra.mxu2 %v293_v9 }
 0x173   :  { %v270_v10 = vpop.f32.mrf.mxu3 }
 0x174   :  { %v271_v11 = vadd.f32 %v859_v38, %v270_v10 }
 0x176   :  { %v294_v12 = vmax.f32 %v271_v11, 0.0 }
 0x178   :  { %370 = vmatmul.f32.vlgmr.msrb.gmra.mxu3 %v294_v12 }
 0x17b   :  { %v273_v13 = vpop.f32.mrf.mxu3 }
 0x17c   :  { %v274_v14 = vadd.f32 %v859_v38, %v273_v13 }
 0x17e   :  { %v295_v15 = vmax.f32 %v274_v14, 0.0 }
 0x180   :  { %373 = vmatmul.f32.gmra.mxu3 %v295_v15 }
 0x183   :  { %v276_v16 = vpop.f32.mrf.mxu3 }
 0x184   :  { %v277_v17 = vadd.f32 %v859_v38, %v276_v16 }
 0x186   :  { %v296_v18 = vmax.f32 %v277_v17, 0.0 }
 0x188   :  { %376 = vmatmul.f32.gmra.mxu3 %v296_v18 }
 0x18b   :  { %v279_v19 = vpop.f32.mrf.mxu3 }
 0x18c   :  { %v280_v20 = vadd.f32 %v859_v38, %v279_v19 }
 0x18e   :  { %v297_v22 = vmax.f32 %v280_v20, 0.0 }
 0x190   :  { %379 = vmatmul.f32.gmra.mxu3 %v297_v22 }
 0x195   :  { %v335_v25 = vpop.f32.mrf.mxu2 }
 0x196   :  { %v1184_v26 = vadd.f32 %v1180_v24, %v335_v25 }
 0x198   :  { %v387_v27 = vsel %vm385_vm1, %v1184_v26, -inf }
 0x199   :  { %403 = vmax.xlane.f32.xlu0 %v387_v27 }
 0x19d   :  { %v338_v28 = vpop.f32.mrf.mxu2 }
 0x19e   :  { %v1190_v29 = vadd.f32 %v1180_v24, %v338_v28 }
 0x1a0   :  { %v1195_v30 = vsel %vm385_vm1, %v1190_v29, -inf }
 0x1a1   :  { %405 = vmax.xlane.f32.xlu0 %v1195_v30 }
 0x1a5   :  { %v341_v31 = vpop.f32.mrf.mxu2 }
 0x1a6   :  { %v1199_v32 = vadd.f32 %v1180_v24, %v341_v31 }
 0x1a8   :  { %v1204_v33 = vsel %vm385_vm1, %v1199_v32, -inf }
 0x1a9   :  { %407 = vmax.xlane.f32.xlu1 %v1204_v33 }
 0x1ad   :  { %v344_v34 = vpop.f32.mrf.mxu2 }
 0x1ae   :  { %v1208_v35 = vadd.f32 %v1180_v24, %v344_v34 }
 0x1b0   :  { %v1213_v37 = vsel %vm385_vm1, %v1208_v35, -inf }
 0x1b1   :  { %409 = vmax.xlane.f32.xlu1 %v1213_v37 }
 0x1b5   :  { %v347_v38 = vpop.f32.mrf.mxu2 }
 0x1b6   :  { %v1217_v39 = vadd.f32 %v1180_v24, %v347_v38 }
 0x1b8   :  { %v1222_v40 = vsel %vm385_vm1, %v1217_v39, -inf }
 0x1b9   :  { %411 = vmax.xlane.f32.xlu2 %v1222_v40 }
 0x1bd   :  { %v350_v41 = vpop.f32.mrf.mxu2 }
 0x1be   :  { %v1226_v42 = vadd.f32 %v1180_v24, %v350_v41 }
 0x1c0   :  { %v1231_v43 = vsel %vm385_vm1, %v1226_v42, -inf }
 0x1c1   :  { %413 = vmax.xlane.f32.xlu2 %v1231_v43 }
 0x1c5   :  { %v353_v44 = vpop.f32.mrf.mxu2 }
 0x1c6   :  { %v1235_v45 = vadd.f32 %v1180_v24, %v353_v44 }
 0x1c8   :  { %v1240_v46 = vsel %vm385_vm1, %v1235_v45, -inf }
 0x1c9   :  { %415 = vmax.xlane.f32.xlu0 %v1240_v46 }
 0x1cd   :  { %v356_v47 = vpop.f32.mrf.mxu2 }
 0x1ce   :  { %v1244_v48 = vadd.f32 %v1180_v24, %v356_v47 }
 0x1d0   :  { %v1249_v36 = vsel %vm385_vm1, %v1244_v48, -inf }
 0x1d1   :  { %417 = vmax.xlane.f32.xlu1 %v1249_v36 }
 0x1d5   :  { %v359_v49 = vpop.f32.mrf.mxu2 }
 0x1d6   :  { %v1253_v50 = vadd.f32 %v1180_v24, %v359_v49 }
 0x1d8   :  { %v1258_v51 = vsel %vm385_vm1, %v1253_v50, -inf }
 0x1d9   :  { %419 = vmax.xlane.f32.xlu2 %v1258_v51 }
 0x1dd   :  { %v362_v52 = vpop.f32.mrf.mxu2 }
 0x1de   :  { %v1262_v53 = vadd.f32 %v1180_v24, %v362_v52 }
 0x1e0   :  { %v1267_v54 = vsel %vm385_vm1, %v1262_v53, -inf }
 0x1e1   :  { %421 = vmax.xlane.f32.xlu0 %v1267_v54 }
 0x1e5   :  { %v365_v55 = vpop.f32.mrf.mxu2 }
 0x1e6   :  { %v1271_v56 = vadd.f32 %v1180_v24, %v365_v55 }
 0x1e8   :  { %v1276_v57 = vsel %vm385_vm1, %v1271_v56, -inf }
 0x1e9   :  { %423 = vmax.xlane.f32.xlu1 %v1276_v57 }
 0x1ed   :  { %v368_v58 = vpop.f32.mrf.mxu2 }
 0x1ee   :  { %v1280_v59 = vadd.f32 %v1180_v24, %v368_v58 }
 0x1f0   :  { %v1285_v60 = vsel %vm385_vm1, %v1280_v59, -inf }
 0x1f1   :  { %425 = vmax.xlane.f32.xlu2 %v1285_v60 }
 0x1fb   :  { %v371_v61 = vpop.f32.mrf.mxu3 }
 0x1fc   :  { %v1289_v62 = vadd.f32 %v1180_v24, %v371_v61 }
 0x1fe   :  { %v1294_v63 = vsel %vm385_vm1, %v1289_v62, -inf }
 0x1ff   :  { %427 = vmax.xlane.f32.xlu0 %v1294_v63 }
 0x203   :  { %v374_v0 = vpop.f32.mrf.mxu3 }
 0x204   :  { %v1298_v1 = vadd.f32 %v1180_v24, %v374_v0 }
 0x206   :  { %v1303_v2 = vsel %vm385_vm1, %v1298_v1, -inf }
 0x207   :  { %429 = vmax.xlane.f32.xlu1 %v1303_v2 }
 0x20b   :  { %v377_v3 = vpop.f32.mrf.mxu3 }
 0x20c   :  { %v1307_v4 = vadd.f32 %v1180_v24, %v377_v3  ;;  %v404_v5 = vpop.xlane.xlu0 %403 }
 0x20d   :  { %v435_v6 = vsub.f32 %v387_v27, %v404_v5 }
 0x20e   :  { %v1312_v7 = vsel %vm385_vm1, %v1307_v4, -inf }
 0x20f   :  { %v451_v8 = vmul.f32 1.442695, %v435_v6  ;;  %431 = vmax.xlane.f32.xlu2 %v1312_v7 }
 0x211   :  { %861 = vpow2.f32 %v451_v8 }
 0x213   :  { %v380_v9 = vpop.f32.mrf.mxu3 }
 0x214   :  { %v1316_v10 = vadd.f32 %v1180_v24, %v380_v9  ;;  %v406_v11 = vpop.xlane.xlu0 %405 }
 0x215   :  { %v436_v12 = vsub.f32 %v1195_v30, %v406_v11 }
 0x216   :  { %v1322_v13 = vsel %vm385_vm1, %v1316_v10, -inf }
 0x217   :  { %v1324_v14 = vpop.eup %861  ;;  %v453_v15 = vmul.f32 1.442695, %v436_v12  ;;  %433 = vmax.xlane.f32.xlu0 %v1322_v13 }
 0x218   :  { %483 = vadd.xlane.f32.xlu1 %v1324_v14 }
 0x219   :  { %863 = vpow2.f32 %v453_v15 }
 0x21c   :  { %v408_v16 = vpop.xlane.xlu1 %407 }
 0x21d   :  { %v437_v17 = vsub.f32 %v1204_v33, %v408_v16 }
 0x21f   :  { %v1329_v18 = vpop.eup %863  ;;  %v455_v19 = vmul.f32 1.442695, %v437_v17 }
 0x220   :  { %485 = vadd.xlane.f32.xlu2 %v1329_v18 }
 0x221   :  { %865 = vpow2.f32 %v455_v19 }
 0x224   :  { %v410_v20 = vpop.xlane.xlu1 %409 }
 0x225   :  { %v438_v21 = vsub.f32 %v1213_v37, %v410_v20 }
 0x227   :  { %v1333_v22 = vpop.eup %865  ;;  %v457_v24 = vmul.f32 1.442695, %v438_v21 }
 0x228   :  { %487 = vadd.xlane.f32.xlu0 %v1333_v22 }
 0x229   :  { %867 = vpow2.f32 %v457_v24 }
 0x22c   :  { %v412_v25 = vpop.xlane.xlu2 %411 }
 0x22d   :  { %v439_v27 = vsub.f32 %v1222_v40, %v412_v25 }
 0x22f   :  { %v1337_v28 = vpop.eup %867  ;;  %v459_v30 = vmul.f32 1.442695, %v439_v27 }
 0x230   :  { %489 = vadd.xlane.f32.xlu1 %v1337_v28 }
 0x231   :  { %869 = vpow2.f32 %v459_v30 }
 0x234   :  { %v414_v31 = vpop.xlane.xlu2 %413 }
 0x235   :  { %v440_v33 = vsub.f32 %v1231_v43, %v414_v31 }
 0x237   :  { %v1341_v34 = vpop.eup %869  ;;  %v461_v37 = vmul.f32 1.442695, %v440_v33 }
 0x238   :  { %491 = vadd.xlane.f32.xlu2 %v1341_v34 }
 0x239   :  { %871 = vpow2.f32 %v461_v37 }
 0x23c   :  { %v416_v38 = vpop.xlane.xlu0 %415 }
 0x23d   :  { %v441_v41 = vsub.f32 %v1240_v46, %v416_v38 }
 0x23f   :  { %v1345_v44 = vpop.eup %871  ;;  %v463_v40 = vmul.f32 1.442695, %v441_v41 }
 0x240   :  { %493 = vadd.xlane.f32.xlu0 %v1345_v44 }
 0x241   :  { %873 = vpow2.f32 %v463_v40 }
 0x244   :  { %v418_v47 = vpop.xlane.xlu1 %417 }
 0x245   :  { %v442_v49 = vsub.f32 %v1249_v36, %v418_v47 }
 0x247   :  { %v1349_v52 = vpop.eup %873  ;;  %v465_v43 = vmul.f32 1.442695, %v442_v49 }
 0x248   :  { %495 = vadd.xlane.f32.xlu1 %v1349_v52 }
 0x249   :  { %875 = vpow2.f32 %v465_v43 }
 0x24c   :  { %v420_v55 = vpop.xlane.xlu2 %419 }
 0x24d   :  { %v443_v58 = vsub.f32 %v1258_v51, %v420_v55 }
 0x24f   :  { %v1353_v61 = vpop.eup %875  ;;  %v467_v46 = vmul.f32 1.442695, %v443_v58 }
 0x250   :  { %497 = vadd.xlane.f32.xlu2 %v1353_v61 }
 0x251   :  { %877 = vpow2.f32 %v467_v46 }
 0x254   :  { %v422_v0 = vpop.xlane.xlu0 %421 }
 0x255   :  { %v444_v3 = vsub.f32 %v1267_v54, %v422_v0 }
 0x257   :  { %v1357_v5 = vpop.eup %877  ;;  %v469_v36 = vmul.f32 1.442695, %v444_v3 }
 0x258   :  { %499 = vadd.xlane.f32.xlu0 %v1357_v5 }
 0x259   :  { %879 = vpow2.f32 %v469_v36 }
 0x25c   :  { %v424_v6 = vpop.xlane.xlu1 %423 }
 0x25d   :  { %v445_v8 = vsub.f32 %v1276_v57, %v424_v6 }
 0x25f   :  { %v1361_v9 = vpop.eup %879  ;;  %v471_v51 = vmul.f32 1.442695, %v445_v8 }
 0x260   :  { %501 = vadd.xlane.f32.xlu1 %v1361_v9 }
 0x261   :  { %881 = vpow2.f32 %v471_v51 }
 0x264   :  { %v426_v11 = vpop.xlane.xlu2 %425 }
 0x265   :  { %v446_v12 = vsub.f32 %v1285_v60, %v426_v11 }
 0x267   :  { %v1365_v15 = vpop.eup %881  ;;  %v473_v54 = vmul.f32 1.442695, %v446_v12 }
 0x268   :  { %503 = vadd.xlane.f32.xlu2 %v1365_v15 }
 0x269   :  { %883 = vpow2.f32 %v473_v54 }
 0x26f   :  { %v1368_v16 = vpop.eup %883 }
 0x270   :  { %505 = vadd.xlane.f32.xlu0 %v1368_v16 }
 0x272   :  { %v428_v57 = vpop.xlane.xlu0 %427 }
 0x273   :  { %v447_v17 = vsub.f32 %v1294_v63, %v428_v57 }
 0x275   :  { %v475_v19 = vmul.f32 1.442695, %v447_v17 }
 0x277   :  { %885 = vpow2.f32 %v475_v19 }
 0x27a   :  { %v430_v20 = vpop.xlane.xlu1 %429 }
 0x27b   :  { %v448_v21 = vsub.f32 %v1303_v2, %v430_v20 }
 0x27d   :  { %v1373_v24 = vpop.eup %885  ;;  %v477_v60 = vmul.f32 1.442695, %v448_v21 }
 0x27e   :  { %507 = vadd.xlane.f32.xlu1 %v1373_v24 }
 0x27f   :  { %887 = vpow2.f32 %v477_v60 }
 0x282   :  { %v432_v25 = vpop.xlane.xlu2 %431 }
 0x283   :  { %v449_v27 = vsub.f32 %v1312_v7, %v432_v25 }
 0x285   :  { %v1377_v30 = vpop.eup %887  ;;  %v479_v31 = vmul.f32 1.442695, %v449_v27 }
 0x286   :  { %509 = vadd.xlane.f32.xlu2 %v1377_v30 }
 0x287   :  { %889 = vpow2.f32 %v479_v31 }
 0x28a   :  { %v434_v63 = vpop.xlane.xlu0 %433 }
 0x28b   :  { %v450_v33 = vsub.f32 %v1322_v13, %v434_v63  ;;  %v484_v37 = vpop.xlane.xlu1 %483 }
 0x28c   :  { %891 = vrcp.f32 %v484_v37  ;;  %v526_v43 = vand.u32 2147483648, %v484_v37  ;;  %v524_v13 = vand.u32 2147483647, %v484_v37  ;;  %vm520_vm3 = vweird.f32 %v484_v37 }
 0x28d   :  { %v1381_v2 = vpop.eup %889  ;;  %v481_v38 = vmul.f32 1.442695, %v450_v33 }
 0x28e   :  { %511 = vadd.xlane.f32.xlu0 %v1381_v2  ;;  %v527_v0 = vor.u32 1.1754944e-38, %v526_v43  ;;  %vm525_vm5 = vcmp.eq.f32.partialorder %v524_v13, 8.507059e+37 }
 0x28f   :  { %893 = vpow2.f32 %v481_v38 }
 0x292   :  { %v892_v41 = vpop.eup %891 }
 0x293   :  { %v516_v40 = vmul.f32 %v892_v41, %v484_v37  ;;  %v486_v7 = vpop.xlane.xlu2 %485  ;;  %vm521_vm2 = vweird.f32 %v892_v41 }
 0x294   :  { %895 = vrcp.f32 %v486_v7  ;;  %vm522_vm4 = vmor %vm520_vm3, %vm521_vm2  ;;  %v540_v12 = vand.u32 2147483648, %v486_v7  ;;  %v538_v17 = vand.u32 2147483647, %v486_v7  ;;  %vm534_vm8 = vweird.f32 %v486_v7 }
 0x295   :  { %v1384_v47 = vpop.eup %893  ;;  %v517_v49 = vsub.f32 1.0, %v516_v40 }
 0x296   :  { %513 = vadd.xlane.f32.xlu1 %v1384_v47  ;;  %v541_v21 = vor.u32 1.1754944e-38, %v540_v12  ;;  %vm539_vm10 = vcmp.eq.f32.partialorder %v538_v17, 8.507059e+37 }
 0x297   :  { %v518_v55 = vmul.f32 %v892_v41, %v517_v49 }
 0x299   :  { %v519_v58 = vadd.f32 %v892_v41, %v518_v55 }
 0x29a   :  { %v896_v46 = vpop.eup %895 }
 0x29b   :  { %v523_v3 = vsel %vm522_vm4, %v892_v41, %v519_v58  ;;  %v530_v36 = vmul.f32 %v896_v46, %v486_v7  ;;  %v488_v6 = vpop.xlane.xlu0 %487  ;;  %vm535_vm7 = vweird.f32 %v896_v46 }
 0x29c   :  { %v528_v8 = vsel %vm525_vm5, %v527_v0, %v523_v3  ;;  %897 = vrcp.f32 %v488_v6  ;;  %vm536_vm9 = vmor %vm534_vm8, %vm535_vm7  ;;  %v554_v33 = vand.u32 2147483648, %v488_v6  ;;  %v552_v38 = vand.u32 2147483647, %v488_v6 }
 0x29d   :  { %v739_v51 = vmul.f32 %v1324_v14, %v528_v8  ;;  %v531_v11 = vsub.f32 1.0, %v530_v36  ;;  %vm548_vm12 = vweird.f32 %v488_v6 }
 0x29e   :  { %v555_v7 = vor.u32 1.1754944e-38, %v554_v33  ;;  %vm553_vm14 = vcmp.eq.f32.partialorder %v552_v38, 8.507059e+37 }
 0x29f   :  { %v755_v54 = vsel %vm386_vm6, %v1184_v26, %v739_v51  ;;  %v532_v57 = vmul.f32 %v896_v46, %v531_v11 }
 0x2a0   :  { %771 = vst [vmem:[#allocation5] sm:$0xff] %v755_v54 }
 0x2a1   :  { %v533_v19 = vadd.f32 %v896_v46, %v532_v57 }
 0x2a2   :  { %v898_v20 = vpop.eup %897 }
 0x2a3   :  { %v537_v60 = vsel %vm536_vm9, %v896_v46, %v533_v19  ;;  %v544_v25 = vmul.f32 %v898_v20, %v488_v6  ;;  %v490_v27 = vpop.xlane.xlu1 %489  ;;  %vm549_vm11 = vweird.f32 %v898_v20 }
 0x2a4   :  { %v542_v14 = vsel %vm539_vm10, %v541_v21, %v537_v60  ;;  %899 = vrcp.f32 %v490_v27  ;;  %vm550_vm13 = vmor %vm548_vm12, %vm549_vm11  ;;  %v568_v46 = vand.u32 2147483648, %v490_v27  ;;  %v566_v3 = vand.u32 2147483647, %v490_v27 }
 0x2a5   :  { %v740_v31 = vmul.f32 %v1329_v18, %v542_v14  ;;  %v545_v63 = vsub.f32 1.0, %v544_v25  ;;  %vm562_vm0 = vweird.f32 %v490_v27 }
 0x2a6   :  { %v569_v8 = vor.u32 1.1754944e-38, %v568_v46  ;;  %vm567_vm2 = vcmp.eq.f32.partialorder %v566_v3, 8.507059e+37 }
 0x2a7   :  { %v756_v26 = vsel %vm386_vm6, %v1190_v29, %v740_v31  ;;  %v546_v37 = vmul.f32 %v898_v20, %v545_v63 }
 0x2a8   :  { %772 = vst [vmem:[#allocation5 + $0x8] sm:$0xff] %v756_v26 }
 0x2a9   :  { %v547_v41 = vadd.f32 %v898_v20, %v546_v37 }
 0x2aa   :  { %v900_v40 = vpop.eup %899 }
 0x2ab   :  { %v551_v49 = vsel %vm550_vm13, %v898_v20, %v547_v41  ;;  %v558_v43 = vmul.f32 %v900_v40, %v490_v27  ;;  %v492_v55 = vpop.xlane.xlu2 %491  ;;  %vm563_vm15 = vweird.f32 %v900_v40 }
 0x2ac   :  { %v556_v18 = vsel %vm553_vm14, %v555_v7, %v551_v49  ;;  %901 = vrcp.f32 %v492_v55  ;;  %vm564_vm1 = vmor %vm562_vm0, %vm563_vm15  ;;  %v582_v17 = vand.u32 2147483648, %v492_v55  ;;  %v580_v20 = vand.u32 2147483647, %v492_v55 }
 0x2ad   :  { %v741_v13 = vmul.f32 %v1333_v22, %v556_v18  ;;  %v559_v58 = vsub.f32 1.0, %v558_v43  ;;  %vm576_vm4 = vweird.f32 %v492_v55 }
 0x2ae   :  { %v583_v25 = vor.u32 1.1754944e-38, %v582_v17  ;;  %vm581_vm7 = vcmp.eq.f32.partialorder %v580_v20, 8.507059e+37 }
 0x2af   :  { %v757_v29 = vsel %vm386_vm6, %v1199_v32, %v741_v13  ;;  %v560_v0 = vmul.f32 %v900_v40, %v559_v58 }
 0x2b0   :  { %773 = vst [vmem:[#allocation5 + $0x10] sm:$0xff] %v757_v29 }
 0x2b1   :  { %v561_v36 = vadd.f32 %v900_v40, %v560_v0 }
 0x2b2   :  { %v902_v6 = vpop.eup %901 }
 0x2b3   :  { %v565_v51 = vsel %vm564_vm1, %v900_v40, %v561_v36  ;;  %v572_v11 = vmul.f32 %v902_v6, %v492_v55  ;;  %v494_v12 = vpop.xlane.xlu0 %493  ;;  %vm577_vm3 = vweird.f32 %v902_v6 }
 0x2b4   :  { %v570_v22 = vsel %vm567_vm2, %v569_v8, %v565_v51  ;;  %903 = vrcp.f32 %v494_v12  ;;  %vm578_vm5 = vmor %vm576_vm4, %vm577_vm3  ;;  %v596_v26 = vand.u32 2147483648, %v494_v12  ;;  %v594_v38 = vand.u32 2147483647, %v494_v12 }
 0x2b5   :  { %v742_v54 = vmul.f32 %v1337_v28, %v570_v22  ;;  %v573_v57 = vsub.f32 1.0, %v572_v11  ;;  %vm590_vm9 = vweird.f32 %v494_v12 }
 0x2b6   :  { %v597_v7 = vor.u32 1.1754944e-38, %v596_v26  ;;  %vm595_vm11 = vcmp.eq.f32.partialorder %v594_v38, 8.507059e+37 }
 0x2b7   :  { %v758_v32 = vsel %vm386_vm6, %v1208_v35, %v742_v54  ;;  %v574_v19 = vmul.f32 %v902_v6, %v573_v57 }
 0x2b8   :  { %774 = vst [vmem:[#allocation5 + $0x18] sm:$0xff] %v758_v32 }
 0x2b9   :  { %v575_v21 = vadd.f32 %v902_v6, %v574_v19 }
 0x2ba   :  { %v904_v60 = vpop.eup %903 }
 0x2bb   :  { %v579_v27 = vsel %vm578_vm5, %v902_v6, %v575_v21  ;;  %v586_v14 = vmul.f32 %v904_v60, %v494_v12  ;;  %v496_v31 = vpop.xlane.xlu1 %495  ;;  %vm591_vm8 = vweird.f32 %v904_v60 }
 0x2bc   :  { %v584_v28 = vsel %vm581_vm7, %v583_v25, %v579_v27  ;;  %905 = vrcp.f32 %v496_v31  ;;  %vm592_vm10 = vmor %vm590_vm9, %vm591_vm8  ;;  %v610_v58 = vand.u32 2147483648, %v496_v31  ;;  %v608_v29 = vand.u32 2147483647, %v496_v31 }
 0x2bd   :  { %v743_v63 = vmul.f32 %v1341_v34, %v584_v28  ;;  %v587_v33 = vsub.f32 1.0, %v586_v14  ;;  %vm604_vm13 = vweird.f32 %v496_v31 }
 0x2be   :  { %v611_v36 = vor.u32 1.1754944e-38, %v610_v58  ;;  %vm609_vm15 = vcmp.eq.f32.partialorder %v608_v29, 8.507059e+37 }
 0x2bf   :  { %v759_v35 = vsel %vm386_vm6, %v1217_v39, %v743_v63  ;;  %v588_v37 = vmul.f32 %v904_v60, %v587_v33 }
 0x2c0   :  { %775 = vst [vmem:[#allocation5 + $0x20] sm:$0xff] %v759_v35 }
 0x2c1   :  { %v589_v41 = vadd.f32 %v904_v60, %v588_v37 }
 0x2c2   :  { %v906_v40 = vpop.eup %905 }
 0x2c3   :  { %v593_v49 = vsel %vm592_vm10, %v904_v60, %v589_v41  ;;  %v600_v43 = vmul.f32 %v906_v40, %v496_v31  ;;  %v498_v55 = vpop.xlane.xlu2 %497  ;;  %vm605_vm12 = vweird.f32 %v906_v40 }
 0x2c4   :  { %v598_v34 = vsel %vm595_vm11, %v597_v7, %v593_v49  ;;  %907 = vrcp.f32 %v498_v55  ;;  %vm606_vm14 = vmor %vm604_vm13, %vm605_vm12  ;;  %v624_v22 = vand.u32 2147483648, %v498_v55  ;;  %v622_v57 = vand.u32 2147483647, %v498_v55 }
 0x2c5   :  { %v744_v18 = vmul.f32 %v1345_v44, %v598_v34  ;;  %v601_v13 = vsub.f32 1.0, %v600_v43  ;;  %vm618_vm1 = vweird.f32 %v498_v55 }
 0x2c6   :  { %v625_v19 = vor.u32 1.1754944e-38, %v624_v22  ;;  %vm623_vm3 = vcmp.eq.f32.partialorder %v622_v57, 8.507059e+37 }
 0x2c7   :  { %v760_v39 = vsel %vm386_vm6, %v1226_v42, %v744_v18  ;;  %v602_v46 = vmul.f32 %v906_v40, %v601_v13 }
 0x2c8   :  { %776 = vst [vmem:[#allocation5 + $0x28] sm:$0xff] %v760_v39 }
 0x2c9   :  { %v603_v0 = vadd.f32 %v906_v40, %v602_v46 }
 0x2ca   :  { %v908_v3 = vpop.eup %907 }
 0x2cb   :  { %v607_v6 = vsel %vm606_vm14, %v906_v40, %v603_v0  ;;  %v614_v8 = vmul.f32 %v908_v3, %v498_v55  ;;  %v500_v51 = vpop.xlane.xlu0 %499  ;;  %vm619_vm0 = vweird.f32 %v908_v3 }
 0x2cc   :  { %v612_v44 = vsel %vm609_vm15, %v611_v36, %v607_v6  ;;  %909 = vrcp.f32 %v500_v51  ;;  %vm620_vm2 = vmor %vm618_vm1, %vm619_vm0  ;;  %v638_v14 = vand.u32 2147483648, %v500_v51  ;;  %v636_v28 = vand.u32 2147483647, %v500_v51 }
 0x2cd   :  { %v745_v11 = vmul.f32 %v1349_v52, %v612_v44  ;;  %v615_v12 = vsub.f32 1.0, %v614_v8  ;;  %vm632_vm5 = vweird.f32 %v500_v51 }
 0x2ce   :  { %v639_v26 = vor.u32 1.1754944e-38, %v638_v14  ;;  %vm637_vm8 = vcmp.eq.f32.partialorder %v636_v28, 8.507059e+37 }
 0x2cf   :  { %v761_v42 = vsel %vm386_vm6, %v1235_v45, %v745_v11  ;;  %v616_v54 = vmul.f32 %v908_v3, %v615_v12 }
 0x2d0   :  { %777 = vst [vmem:[#allocation5 + $0x30] sm:$0xff] %v761_v42 }
 0x2d1   :  { %v617_v17 = vadd.f32 %v908_v3, %v616_v54 }
 0x2d2   :  { %v910_v32 = vpop.eup %909 }
 0x2d3   :  { %v621_v20 = vsel %vm620_vm2, %v908_v3, %v617_v17  ;;  %v628_v21 = vmul.f32 %v910_v32, %v500_v51  ;;  %v502_v60 = vpop.xlane.xlu1 %501  ;;  %vm633_vm4 = vweird.f32 %v910_v32 }
 0x2d4   :  { %v626_v52 = vsel %vm623_vm3, %v625_v19, %v621_v20  ;;  %911 = vrcp.f32 %v502_v60  ;;  %vm634_vm7 = vmor %vm632_vm5, %vm633_vm4  ;;  %v652_v7 = vand.u32 2147483648, %v502_v60  ;;  %v650_v43 = vand.u32 2147483647, %v502_v60 }
 0x2d5   :  { %v746_v25 = vmul.f32 %v1353_v61, %v626_v52  ;;  %v629_v27 = vsub.f32 1.0, %v628_v21  ;;  %vm646_vm10 = vweird.f32 %v502_v60 }
 0x2d6   :  { %v653_v18 = vor.u32 1.1754944e-38, %v652_v7  ;;  %vm651_vm12 = vcmp.eq.f32.partialorder %v650_v43, 8.507059e+37 }
 0x2d7   :  { %v762_v45 = vsel %vm386_vm6, %v1244_v48, %v746_v25  ;;  %v630_v31 = vmul.f32 %v910_v32, %v629_v27 }
 0x2d8   :  { %778 = vst [vmem:[#allocation5 + $0x38] sm:$0xff] %v762_v45 }
 0x2d9   :  { %v631_v63 = vadd.f32 %v910_v32, %v630_v31 }
 0x2da   :  { %v912_v33 = vpop.eup %911 }
 0x2db   :  { %v635_v35 = vsel %vm634_vm7, %v910_v32, %v631_v63  ;;  %v642_v37 = vmul.f32 %v912_v33, %v502_v60  ;;  %v504_v38 = vpop.xlane.xlu2 %503  ;;  %vm647_vm9 = vweird.f32 %v912_v33 }
 0x2dc   :  { %v640_v61 = vsel %vm637_vm8, %v639_v26, %v635_v35  ;;  %913 = vrcp.f32 %v504_v38  ;;  %vm648_vm11 = vmor %vm646_vm10, %vm647_vm9  ;;  %v666_v0 = vand.u32 2147483648, %v504_v38  ;;  %v664_v36 = vand.u32 2147483647, %v504_v38 }
 0x2dd   :  { %v747_v41 = vmul.f32 %v1357_v5, %v640_v61  ;;  %v643_v40 = vsub.f32 1.0, %v642_v37  ;;  %vm660_vm14 = vweird.f32 %v504_v38 }
 0x2de   :  { %v667_v51 = vor.u32 1.1754944e-38, %v666_v0  ;;  %vm665_vm0 = vcmp.eq.f32.partialorder %v664_v36, 8.507059e+37 }
 0x2df   :  { %v763_v48 = vsel %vm386_vm6, %v1253_v50, %v747_v41  ;;  %v644_v49 = vmul.f32 %v912_v33, %v643_v40 }
 0x2e0   :  { %779 = vst [vmem:[#allocation5 + $0x40] sm:$0xff] %v763_v48 }
 0x2e1   :  { %v645_v55 = vadd.f32 %v912_v33, %v644_v49 }
 0x2e2   :  { %v914_v34 = vpop.eup %913 }
 0x2e3   :  { %v649_v13 = vsel %vm648_vm11, %v912_v33, %v645_v55  ;;  %v656_v58 = vmul.f32 %v914_v34, %v504_v38  ;;  %v506_v39 = vpop.xlane.xlu0 %505  ;;  %vm661_vm13 = vweird.f32 %v914_v34 }
 0x2e4   :  { %v654_v5 = vsel %vm651_vm12, %v653_v18, %v649_v13  ;;  %915 = vrcp.f32 %v506_v39  ;;  %vm662_vm15 = vmor %vm660_vm14, %vm661_vm13  ;;  %v680_v42 = vand.u32 2147483648, %v506_v39  ;;  %v678_v57 = vand.u32 2147483647, %v506_v39 }
 0x2e5   :  { %v748_v46 = vmul.f32 %v1361_v9, %v654_v5  ;;  %v657_v29 = vsub.f32 1.0, %v656_v58  ;;  %vm674_vm2 = vweird.f32 %v506_v39 }
 0x2e6   :  { %v681_v19 = vor.u32 1.1754944e-38, %v680_v42  ;;  %vm679_vm4 = vcmp.eq.f32.partialorder %v678_v57, 8.507059e+37 }
 0x2e7   :  { %v764_v50 = vsel %vm386_vm6, %v1262_v53, %v748_v46  ;;  %v658_v3 = vmul.f32 %v914_v34, %v657_v29 }
 0x2e8   :  { %780 = vst [vmem:[#allocation5 + $0x48] sm:$0xff] %v764_v50 }
 0x2e9   :  { %v659_v6 = vadd.f32 %v914_v34, %v658_v3 }
 0x2ea   :  { %v916_v8 = vpop.eup %915 }
 0x2eb   :  { %v663_v44 = vsel %vm662_vm15, %v914_v34, %v659_v6  ;;  %v670_v11 = vmul.f32 %v916_v8, %v506_v39  ;;  %vm675_vm1 = vweird.f32 %v916_v8 }
 0x2ec   :  { %v668_v12 = vsel %vm665_vm0, %v667_v51, %v663_v44  ;;  %vm676_vm3 = vmor %vm674_vm2, %vm675_vm1 }
 0x2ed   :  { %v749_v9 = vmul.f32 %v1365_v15, %v668_v12  ;;  %v671_v22 = vsub.f32 1.0, %v670_v11 }
 0x2ef   :  { %v765_v53 = vsel %vm386_vm6, %v1271_v56, %v749_v9  ;;  %v672_v54 = vmul.f32 %v916_v8, %v671_v22 }
 0x2f0   :  { %781 = vst [vmem:[#allocation5 + $0x50] sm:$0xff] %v765_v53 }
 0x2f1   :  { %v673_v17 = vadd.f32 %v916_v8, %v672_v54  ;;  %v508_v32 = vpop.xlane.xlu1 %507 }
 0x2f2   :  { %917 = vrcp.f32 %v508_v32  ;;  %v694_v14 = vand.u32 2147483648, %v508_v32  ;;  %v692_v31 = vand.u32 2147483647, %v508_v32  ;;  %vm688_vm7 = vweird.f32 %v508_v32 }
 0x2f3   :  { %v677_v20 = vsel %vm676_vm3, %v916_v8, %v673_v17 }
 0x2f4   :  { %v682_v21 = vsel %vm679_vm4, %v681_v19, %v677_v20  ;;  %v695_v33 = vor.u32 1.1754944e-38, %v694_v14  ;;  %vm693_vm9 = vcmp.eq.f32.partialorder %v692_v31, 8.507059e+37 }
 0x2f5   :  { %v750_v15 = vmul.f32 %v1368_v16, %v682_v21 }
 0x2f7   :  { %v766_v60 = vsel %vm386_vm6, %v1280_v59, %v750_v15 }
 0x2f8   :  { %v918_v56 = vpop.eup %917  ;;  %782 = vst [vmem:[#allocation5 + $0x58] sm:$0xff] %v766_v60 }
 0x2f9   :  { %v684_v52 = vmul.f32 %v918_v56, %v508_v32  ;;  %v510_v25 = vpop.xlane.xlu2 %509  ;;  %vm689_vm5 = vweird.f32 %v918_v56 }
 0x2fa   :  { %919 = vrcp.f32 %v510_v25  ;;  %vm690_vm8 = vmor %vm688_vm7, %vm689_vm5  ;;  %v708_v61 = vand.u32 2147483648, %v510_v25  ;;  %v706_v7 = vand.u32 2147483647, %v510_v25  ;;  %vm702_vm11 = vweird.f32 %v510_v25 }
 0x2fb   :  { %v685_v27 = vsub.f32 1.0, %v684_v52 }
 0x2fc   :  { %v709_v43 = vor.u32 1.1754944e-38, %v708_v61  ;;  %vm707_vm13 = vcmp.eq.f32.partialorder %v706_v7, 8.507059e+37 }
 0x2fd   :  { %v686_v45 = vmul.f32 %v918_v56, %v685_v27 }
 0x2ff   :  { %v687_v28 = vadd.f32 %v918_v56, %v686_v45 }
 0x300   :  { %v920_v63 = vpop.eup %919 }
 0x301   :  { %v691_v16 = vsel %vm690_vm8, %v918_v56, %v687_v28  ;;  %v698_v26 = vmul.f32 %v920_v63, %v510_v25  ;;  %v512_v35 = vpop.xlane.xlu0 %511  ;;  %vm703_vm10 = vweird.f32 %v920_v63 }
 0x302   :  { %v696_v59 = vsel %vm693_vm9, %v695_v33, %v691_v16  ;;  %921 = vrcp.f32 %v512_v35  ;;  %vm704_vm12 = vmor %vm702_vm11, %vm703_vm10  ;;  %v722_v39 = vand.u32 2147483648, %v512_v35  ;;  %v720_v46 = vand.u32 2147483647, %v512_v35 }
 0x303   :  { %v751_v37 = vmul.f32 %v1373_v24, %v696_v59  ;;  %v699_v38 = vsub.f32 1.0, %v698_v26  ;;  %vm716_vm15 = vweird.f32 %v512_v35 }
 0x304   :  { %v723_v50 = vor.u32 1.1754944e-38, %v722_v39  ;;  %vm721_vm1 = vcmp.eq.f32.partialorder %v720_v46, 8.507059e+37 }
 0x305   :  { %v767_v41 = vsel %vm386_vm6, %v1289_v62, %v751_v37  ;;  %v700_v40 = vmul.f32 %v920_v63, %v699_v38 }
 0x306   :  { %783 = vst [vmem:[#allocation5 + $0x60] sm:$0xff] %v767_v41 }
 0x307   :  { %v701_v48 = vadd.f32 %v920_v63, %v700_v40 }
 0x308   :  { %v922_v49 = vpop.eup %921 }
 0x309   :  { %v705_v55 = vsel %vm704_vm12, %v920_v63, %v701_v48  ;;  %v712_v34 = vmul.f32 %v922_v49, %v512_v35  ;;  %v514_v18 = vpop.xlane.xlu1 %513  ;;  %vm717_vm14 = vweird.f32 %v922_v49 }
 0x30a   :  { %v710_v24 = vsel %vm707_vm13, %v709_v43, %v705_v55  ;;  %923 = vrcp.f32 %v514_v18  ;;  %vm718_vm0 = vmor %vm716_vm15, %vm717_vm14  ;;  %v736_v51 = vand.u32 2147483648, %v514_v18  ;;  %v734_v11 = vand.u32 2147483647, %v514_v18 }
 0x30b   :  { %v752_v13 = vmul.f32 %v1377_v30, %v710_v24  ;;  %v713_v58 = vsub.f32 1.0, %v712_v34  ;;  %vm730_vm3 = vweird.f32 %v514_v18 }
 0x30c   :  { %v737_v9 = vor.u32 1.1754944e-38, %v736_v51  ;;  %vm735_vm5 = vcmp.eq.f32.partialorder %v734_v11, 8.507059e+37 }
 0x30d   :  { %v768_v62 = vsel %vm386_vm6, %v1298_v1, %v752_v13  ;;  %v714_v5 = vmul.f32 %v922_v49, %v713_v58 }
 0x30e   :  { %784 = vst [vmem:[#allocation5 + $0x68] sm:$0xff] %v768_v62 }
 0x30f   :  { %v715_v29 = vadd.f32 %v922_v49, %v714_v5 }
 0x310   :  { %v924_v0 = vpop.eup %923 }
 0x311   :  { %v719_v3 = vsel %vm718_vm0, %v922_v49, %v715_v29  ;;  %v726_v36 = vmul.f32 %v924_v0, %v514_v18  ;;  %vm731_vm2 = vweird.f32 %v924_v0 }
 0x312   :  { %v724_v6 = vsel %vm721_vm1, %v723_v50, %v719_v3  ;;  %vm732_vm4 = vmor %vm730_vm3, %vm731_vm2 }
 0x313   :  { %v753_v30 = vmul.f32 %v1381_v2, %v724_v6  ;;  %v727_v8 = vsub.f32 1.0, %v726_v36 }
 0x315   :  { %v769_v1 = vsel %vm386_vm6, %v1307_v4, %v753_v30  ;;  %v728_v44 = vmul.f32 %v924_v0, %v727_v8 }
 0x316   :  { %785 = vst [vmem:[#allocation5 + $0x70] sm:$0xff] %v769_v1 }
 0x317   :  { %v729_v12 = vadd.f32 %v924_v0, %v728_v44 }
 0x319   :  { %v733_v22 = vsel %vm732_vm4, %v924_v0, %v729_v12 }
 0x31a   :  { %v738_v2 = vsel %vm735_vm5, %v737_v9, %v733_v22 }
 0x31b   :  { %v754_v42 = vmul.f32 %v1384_v47, %v738_v2 }
 0x31d   :  { %v770_v4 = vsel %vm386_vm6, %v1316_v10, %v754_v42 }
 0x31e   :  { %786 = vst [vmem:[#allocation5 + $0x78] sm:$0xff] %v770_v4 }
 0x31f   :  { %799 = dma.vmem_to_hbm [thread:$0]  %s792_s12, 2048, %s794_s15, [#allocation4], %s978_s29, %s978_s29, %s979_s30  }
 0x320   :  { %975 = dma.done.wait [#allocation4], 2048  }
 0x321   :  { %976 = vsyncadd [#allocation4], 4294965248 }
 0x322   :  { %804 = vsyncpa [#allocation3], 1 }
 0x323   :  { %805 = vsyncpa [#allocation4], 1 }

</bundles_post_ra>
